<compile_context>
chip_gen: v7x
topology: tpu7x:2x2x1
jax: 0.10.0
libtpu: 0.0.40
codegen_flags: <defaults>
</compile_context>

<pallas_src>
import jax
import jax.numpy as jnp
from jax.experimental import pallas as pl
from jax.experimental.pallas import tpu as pltpu

EMBED_DIM = 32
OUT_DIM = 3
PACK = 4                       # tokens packed per lane-row
PACKED_E = PACK * EMBED_DIM    # 128 (full vreg lane width)
PACKED_OUT = PACK * OUT_DIM    # 12
TMP_TARGET = 8192              # packed rows per grid step == 32768 tokens


def _round_up(n, m):
    return ((n + m - 1) // m) * m


def _cdiv(a, b):
    return (a + b - 1) // b


def _classifier_kernel(x_ref, w1_ref, b1_ref, w2_ref, b2_ref, o_ref):
    # x_ref:  (TMp, 128)  4 tokens per row, lane-dense
    # w1_ref: (128, 128)  block-diagonal kron(I4, conv1 weight^T)
    # b1_ref: (1, 128)    conv1 bias tiled 4x
    # w2_ref: (128, 12)   block-diagonal kron(I4, linear1 weight^T)
    # b2_ref: (1, 12)     linear1 bias tiled 4x
    # o_ref:  (TMp, 12)
    h = jnp.dot(x_ref[...], w1_ref[...], preferred_element_type=jnp.float32)
    h = jnp.maximum(h + b1_ref[...], 0.0)                       # ReLU (f32)
    o = jnp.dot(h, w2_ref[...], preferred_element_type=jnp.float32)
    o_ref[...] = (o + b2_ref[...]).astype(o_ref.dtype)


@jax.jit
def classifier_per_time(x, conv_w, conv_b, lin_w, lin_b):
    """x: (B, T, E) f32.  conv_w: (E, E, 1), conv_b: (E,), lin_w: (3, E), lin_b: (3,)."""
    B, T, E = x.shape
    assert E == EMBED_DIM, E
    dtype = x.dtype
    M = B * T
    M4 = _round_up(M, PACK)

    x2d = x.reshape(M, E)
    if M4 != M:
        # Rare, tiny (<=3 row) pad only when B*T isn't a multiple of 4.
        x2d = jnp.pad(x2d, ((0, M4 - M), (0, 0)))
    Mp = M4 // PACK
    xp = x2d.reshape(Mp, PACKED_E)          # free reshape: rows are contiguous

    # Conv1d(kernel_size=1): weight (E_out, E_in, 1) -> matmul matrix (E_in, E_out)
    w1t = jnp.transpose(conv_w[:, :, 0], (1, 0)).astype(dtype)     # (E, E)
    # Linear(E -> 3): weight (3, E) -> (E, 3)
    w2t = jnp.transpose(lin_w, (1, 0)).astype(dtype)               # (E, 3)

    eye = jnp.eye(PACK, dtype=dtype)
    w1p = jnp.kron(eye, w1t)                                       # (128, 128)
    w2p = jnp.kron(eye, w2t)                                       # (128, 12)
    b1p = jnp.tile(conv_b.astype(dtype), PACK).reshape(1, PACKED_E)   # (1, 128)
    b2p = jnp.tile(lin_b.astype(dtype), PACK).reshape(1, PACKED_OUT)  # (1, 12)

    # Row tile: big enough to amortize per-step overhead, small enough to keep
    # >= ~4 grid steps (v7x megacore sharding), multiple of 8 sublanes.
    TMp = min(TMP_TARGET, max(8, _round_up(_cdiv(Mp, 4), 8)))
    grid = _cdiv(Mp, TMp)

    itemsize = jnp.dtype(dtype).itemsize
    cost = pl.CostEstimate(
        flops=2 * Mp * PACKED_E * (PACKED_E + PACKED_OUT),
        bytes_accessed=(Mp * (PACKED_E + PACKED_OUT)
                        + PACKED_E * (PACKED_E + PACKED_OUT)) * itemsize,
        transcendentals=0,
    )

    outp = pl.pallas_call(
        _classifier_kernel,
        out_shape=jax.ShapeDtypeStruct((Mp, PACKED_OUT), dtype),
        grid_spec=pltpu.PrefetchScalarGridSpec(
            num_scalar_prefetch=0,
            grid=(grid,),
            in_specs=[
                pl.BlockSpec((TMp, PACKED_E), lambda i: (i, 0)),       # tokens
                pl.BlockSpec((PACKED_E, PACKED_E), lambda i: (0, 0)),  # resident weights
                pl.BlockSpec((1, PACKED_E), lambda i: (0, 0)),
                pl.BlockSpec((PACKED_E, PACKED_OUT), lambda i: (0, 0)),
                pl.BlockSpec((1, PACKED_OUT), lambda i: (0, 0)),
            ],
            out_specs=pl.BlockSpec((TMp, PACKED_OUT), lambda i: (i, 0)),
        ),
        compiler_params=pltpu.CompilerParams(
            dimension_semantics=("parallel",)),                        # megacore on v7x
        cost_estimate=cost,
    )(xp, w1p, b1p, w2p, b2p)

    # (Mp, 12) -> (M4, 3) is a free row-contiguous reshape; [:M] is a no-op
    # whenever B*T is a multiple of 4.
    return outp.reshape(M4, OUT_DIM)[:M].reshape(B, T, OUT_DIM)


def _reference(x, conv_w, conv_b, lin_w, lin_b):
    # Pure-JAX reference matching the PyTorch forward exactly.
    h = jnp.einsum('bte,oe->bto', x, conv_w[:, :, 0]) + conv_b      # Conv1d k=1
    h = jnp.maximum(h, 0.0)
    return jnp.einsum('bte,oe->bto', h, lin_w) + lin_b


if __name__ == "__main__":
    B, T, E = 2, 8, EMBED_DIM  # small shapes: batch=2, seq=8, embed_dim=32

    key = jax.random.PRNGKey(0)
    kx, k1, k2, k3, k4 = jax.random.split(key, 5)

    x = jax.random.normal(kx, (B, T, E), dtype=jnp.float32)

    # Deterministic parameter init (uniform, PyTorch-like fan_in scaling).
    bound1 = 1.0 / (E ** 0.5)
    conv_w = jax.random.uniform(k1, (E, E, 1), jnp.float32, -bound1, bound1)
    conv_b = jax.random.uniform(k2, (E,), jnp.float32, -bound1, bound1)
    lin_w = jax.random.uniform(k3, (OUT_DIM, E), jnp.float32, -bound1, bound1)
    lin_b = jax.random.uniform(k4, (OUT_DIM,), jnp.float32, -bound1, bound1)

    out = classifier_per_time(x, conv_w, conv_b, lin_w, lin_b)
    out = jax.block_until_ready(out)

    ref = _reference(x, conv_w, conv_b, lin_w, lin_b)
    assert out.shape == (B, T, OUT_DIM), out.shape
    assert jnp.allclose(out, ref, atol=1e-5, rtol=1e-5), \
        float(jnp.max(jnp.abs(out - ref)))

    print("KERNEL_OK")
</pallas_src>

<mosaic_0001>
module attributes {stable_mosaic.version = 11 : i64} {
  func.func @_classifier_kernel(%arg0: i32, %arg1: memref<8x128xf32, #tpu.memory_space<vmem>>, %arg2: memref<128x128xf32, #tpu.memory_space<vmem>>, %arg3: memref<1x128xf32, #tpu.memory_space<vmem>>, %arg4: memref<128x12xf32, #tpu.memory_space<vmem>>, %arg5: memref<1x12xf32, #tpu.memory_space<vmem>>, %arg6: memref<8x12xf32, #tpu.memory_space<vmem>>) attributes {dimension_semantics = [#tpu.dimension_semantics<parallel>], iteration_bounds = array<i64: 1>, scalar_prefetch = 0 : i64, scratch_operands = 0 : i64, tpu.core_type = #tpu.core_type<tc>, window_params = [{transform_indices = @transform_0, window_bounds = array<i64: 8, 128>}, {pipeline_mode = #tpu.pipeline_mode<synchronous>, transform_indices = @transform_1, window_bounds = array<i64: 128, 128>}, {pipeline_mode = #tpu.pipeline_mode<synchronous>, transform_indices = @transform_2, window_bounds = array<i64: 1, 128>}, {pipeline_mode = #tpu.pipeline_mode<synchronous>, transform_indices = @transform_3, window_bounds = array<i64: 128, 12>}, {pipeline_mode = #tpu.pipeline_mode<synchronous>, transform_indices = @transform_4, window_bounds = array<i64: 1, 12>}, {transform_indices = @transform_5, window_bounds = array<i64: 8, 12>}]} {
    %c0 = arith.constant 0 : index
    %c0_0 = arith.constant 0 : index
    %0 = vector.load %arg1[%c0, %c0_0] : memref<8x128xf32, #tpu.memory_space<vmem>>, vector<8x128xf32>
    %c0_1 = arith.constant 0 : index
    %c0_2 = arith.constant 0 : index
    %1 = vector.load %arg2[%c0_1, %c0_2] : memref<128x128xf32, #tpu.memory_space<vmem>>, vector<128x128xf32>
    %cst = arith.constant dense<0.000000e+00> : vector<8x128xf32>
    %2 = tpu.matmul %0, %1, %cst {dimension_numbers = #tpu.dot_dimension_numbers<[1], [0], [0], [1], [0, 0, 1, 1], [], []>} : vector<8x128xf32>, vector<128x128xf32>, vector<8x128xf32> -> vector<8x128xf32>
    %c0_3 = arith.constant 0 : index
    %c0_4 = arith.constant 0 : index
    %3 = vector.load %arg3[%c0_3, %c0_4] : memref<1x128xf32, #tpu.memory_space<vmem>>, vector<1x128xf32>
    %4 = vector.broadcast %3 : vector<1x128xf32> to vector<8x128xf32>
    %5 = arith.addf %2, %4 : vector<8x128xf32>
    %cst_5 = arith.constant 0.000000e+00 : f32
    %6 = vector.broadcast %cst_5 : f32 to vector<8x128xf32>
    %7 = arith.maximumf %5, %6 : vector<8x128xf32>
    %c0_6 = arith.constant 0 : index
    %c0_7 = arith.constant 0 : index
    %8 = vector.load %arg4[%c0_6, %c0_7] : memref<128x12xf32, #tpu.memory_space<vmem>>, vector<128x12xf32>
    %cst_8 = arith.constant dense<0.000000e+00> : vector<8x12xf32>
    %9 = tpu.matmul %7, %8, %cst_8 {dimension_numbers = #tpu.dot_dimension_numbers<[1], [0], [0], [1], [0, 0, 1, 1], [], []>} : vector<8x128xf32>, vector<128x12xf32>, vector<8x12xf32> -> vector<8x12xf32>
    %c0_9 = arith.constant 0 : index
    %c0_10 = arith.constant 0 : index
    %10 = vector.load %arg5[%c0_9, %c0_10] : memref<1x12xf32, #tpu.memory_space<vmem>>, vector<1x12xf32>
    %11 = vector.broadcast %10 : vector<1x12xf32> to vector<8x12xf32>
    %12 = arith.addf %9, %11 : vector<8x12xf32>
    %c0_11 = arith.constant 0 : index
    %c0_12 = arith.constant 0 : index
    %13 = vector.load %arg6[%c0_11, %c0_12] : memref<8x12xf32, #tpu.memory_space<vmem>>, vector<8x12xf32>
    tpu.vector_store %arg6[%c0_11, %c0_12], %12 {strides = array<i32>} : memref<8x12xf32, #tpu.memory_space<vmem>>, vector<8x12xf32>,
    return
  }
  func.func @transform_0(%arg0: i32) -> (i32, i32) {
    %c0_i32 = arith.constant 0 : i32
    %c0_i32_0 = arith.constant 0 : i32
    return %arg0, %c0_i32 : i32, i32
  }
  func.func @transform_1(%arg0: i32) -> (i32, i32) {
    %c0_i32 = arith.constant 0 : i32
    %c0_i32_0 = arith.constant 0 : i32
    %c0_i32_1 = arith.constant 0 : i32
    return %c0_i32, %c0_i32_0 : i32, i32
  }
  func.func @transform_2(%arg0: i32) -> (i32, i32) {
    %c0_i32 = arith.constant 0 : i32
    %c0_i32_0 = arith.constant 0 : i32
    %c0_i32_1 = arith.constant 0 : i32
    return %c0_i32, %c0_i32_0 : i32, i32
  }
  func.func @transform_3(%arg0: i32) -> (i32, i32) {
    %c0_i32 = arith.constant 0 : i32
    %c0_i32_0 = arith.constant 0 : i32
    %c0_i32_1 = arith.constant 0 : i32
    return %c0_i32, %c0_i32_0 : i32, i32
  }
  func.func @transform_4(%arg0: i32) -> (i32, i32) {
    %c0_i32 = arith.constant 0 : i32
    %c0_i32_0 = arith.constant 0 : i32
    %c0_i32_1 = arith.constant 0 : i32
    return %c0_i32, %c0_i32_0 : i32, i32
  }
  func.func @transform_5(%arg0: i32) -> (i32, i32) {
    %c0_i32 = arith.constant 0 : i32
    %c0_i32_0 = arith.constant 0 : i32
    return %arg0, %c0_i32 : i32, i32
  }
}

</mosaic_0001>

<bundles_post_ra>
// kernel: tile.13
= control target key start
LH: loop header
LB: loop body
LE: loop exit
PB: predicated region body
PF: predicated region fallthrough
CT: control target
= control target key end

     0   :  { %s22_s0 = inlined_call_operand.vmem [shape: f32[32], index: 0, kind: input, shape index: {}]   ;;  %s23_s1 = inlined_call_operand.vmem [shape: f32[4,32], index: 1, kind: output, shape index: {}]  }
   0x1   :  { %v4_v0 = vld [vmem:[%s22_s0] ss:$0 sm:$0xff] }
   0x2   :  { %5 = vst [vmem:[%s23_s1] sm:$0xf] %v4_v0 }

// kernel: tile.14
= control target key start
LH: loop header
LB: loop body
LE: loop exit
PB: predicated region body
PF: predicated region fallthrough
CT: control target
= control target key end

     0   :  { %vm7_vm0 = vcmask 261120   ;;  %s37_s8 = smov 32   ;;  %s38_s9 = smov 64   ;;  %vm13_vm1 = vcmask 1048320   ;;  %vm19_vm2 = vcmask 785920   ;;  %vm25_vm3 = vcmask 523520   ;;  %s55_s0 = inlined_call_operand.vmem [shape: f32[4,32], index: 0, kind: input, shape index: {}]   ;;  %s56_s1 = inlined_call_operand.vmem [shape: f32[1,128], index: 1, kind: output, shape index: {}]  }
   0x1   :  { %v4_v0 = vld [vmem:[%s55_s0] sm:$0xf]  ;;  %s36_s0 = smov 96  }
   0x2   :  { %5 = vst [vmem:[#allocation1] sm:$0xf] %v4_v0 }
   0x9   :  { %v10_v1 = vld [vmem:[#allocation1 + $0x3] sm:$0x1]   ;;  %v22_v2 = vld [vmem:[#allocation1 + $0x1] sm:$0x1]   ;;  %v6_v3 = vld [vmem:[#allocation1] sm:$0x1]  }
   0xa   :  { %11 = vrot.lane.b32.xlu0 %v10_v1, %s36_s0  ;;  %23 = vrot.lane.b32.xlu1 %v22_v2, %s37_s8  ;;  %v16_v4 = vld [vmem:[#allocation1 + $0x2] sm:$0x1]   ;;  %8 = vst.msk [vmem:[#allocation0] sm:$0x1] %vm7_vm0, %v6_v3  }
   0xe   :  { %17 = vrot.lane.b32.xlu0 %v16_v4, %s38_s9 }
  0x7c   :  { %v12_v5 = vpop.permute.xlu0 %11   ;;  %v24_v6 = vpop.permute.xlu1 %23  }
  0x7d   :  { %14 = vst.msk [vmem:[#allocation0] sm:$0x1] %vm13_vm1, %v12_v5  }
  0x80   :  { %v18_v7 = vpop.permute.xlu0 %17  }
  0x81   :  { %20 = vst.msk [vmem:[#allocation0] sm:$0x1] %vm19_vm2, %v18_v7  }
  0x82   :  { %26 = vst.msk [vmem:[#allocation0] sm:$0x1] %vm25_vm3, %v24_v6  }
  0x89   :  { %v30_v8 = vld [vmem:[#allocation0] sm:$0x1] }
  0x8a   :  { %32 = vst [vmem:[%s56_s1] sm:$0x1] %v30_v8 }

// kernel: tile.18
= control target key start
LH: loop header
LB: loop body
LE: loop exit
PB: predicated region body
PF: predicated region fallthrough
CT: control target
= control target key end

     0   :  { %s22_s0 = inlined_call_operand.vmem [shape: f32[3], index: 0, kind: input, shape index: {}]   ;;  %s23_s1 = inlined_call_operand.vmem [shape: f32[4,3], index: 1, kind: output, shape index: {}]  }
   0x1   :  { %v4_v0 = vld [vmem:[%s22_s0] ss:$0 sm:$0xff] }
   0x2   :  { %5 = vst [vmem:[%s23_s1] sm:$0xf] %v4_v0 }

// kernel: tile.19
= control target key start
LH: loop header
LB: loop body
LE: loop exit
PB: predicated region body
PF: predicated region fallthrough
CT: control target
= control target key end

     0   :  { %vm7_vm0 = vcmask 23552   ;;  %s37_s8 = smov 3   ;;  %s38_s9 = smov 6   ;;  %vm13_vm1 = vcmask 97352   ;;  %vm19_vm2 = vcmask 72752   ;;  %vm25_vm3 = vcmask 48152   ;;  %s55_s0 = inlined_call_operand.vmem [shape: f32[4,3], index: 0, kind: input, shape index: {}]   ;;  %s56_s1 = inlined_call_operand.vmem [shape: f32[1,12], index: 1, kind: output, shape index: {}]  }
   0x1   :  { %v4_v0 = vld [vmem:[%s55_s0] sm:$0xf]  ;;  %s36_s0 = smov 9  }
   0x2   :  { %5 = vst [vmem:[#allocation1] sm:$0xf] %v4_v0 }
   0x9   :  { %v10_v1 = vld [vmem:[#allocation1 + $0x3] sm:$0x1]   ;;  %v22_v2 = vld [vmem:[#allocation1 + $0x1] sm:$0x1]   ;;  %v6_v3 = vld [vmem:[#allocation1] sm:$0x1]  }
   0xa   :  { %11 = vrot.lane.b32.xlu0 %v10_v1, %s36_s0  ;;  %23 = vrot.lane.b32.xlu1 %v22_v2, %s37_s8  ;;  %v16_v4 = vld [vmem:[#allocation1 + $0x2] sm:$0x1]   ;;  %8 = vst.msk [vmem:[#allocation0] sm:$0x1] %vm7_vm0, %v6_v3  }
   0xe   :  { %17 = vrot.lane.b32.xlu0 %v16_v4, %s38_s9 }
  0x7c   :  { %v12_v5 = vpop.permute.xlu0 %11   ;;  %v24_v6 = vpop.permute.xlu1 %23  }
  0x7d   :  { %14 = vst.msk [vmem:[#allocation0] sm:$0x1] %vm13_vm1, %v12_v5  }
  0x80   :  { %v18_v7 = vpop.permute.xlu0 %17  }
  0x81   :  { %20 = vst.msk [vmem:[#allocation0] sm:$0x1] %vm19_vm2, %v18_v7  }
  0x82   :  { %26 = vst.msk [vmem:[#allocation0] sm:$0x1] %vm25_vm3, %v24_v6  }
  0x89   :  { %v30_v8 = vld [vmem:[#allocation0] sm:$0x1] }
  0x8a   :  { %32 = vst [vmem:[%s56_s1] sm:$0x1] %v30_v8 }

// kernel: classifier_per_time.1
= control target key start
LH: loop header
LB: loop body
LE: loop exit
PB: predicated region body
PF: predicated region fallthrough
CT: control target
= control target key end

     0   :  { %v406_v3 = vmov 0.0|0.0   ;;  %vm407_vm0 = vmmov 0   ;;  %v408_v6 = vmov 0.0   ;;  %vm208_vm1 = vcmask 97280   ;;  %s563_s0 = inlined_call_operand.vmem [shape: f32[4,128], index: 0, kind: input, shape index: {}]   ;;  %s564_s1 = inlined_call_operand.vmem [shape: f32[128,128], index: 1, kind: input, shape index: {}]   ;;  %s565_s2 = inlined_call_operand.vmem [shape: f32[1,128], index: 2, kind: input, shape index: {}]   ;;  %s566_s3 = inlined_call_operand.vmem [shape: f32[128,12], index: 3, kind: input, shape index: {}]   ;;  %s567_s4 = inlined_call_operand.vmem [shape: f32[1,12], index: 4, kind: input, shape index: {}]   ;;  %s568_s5 = inlined_call_operand.vmem [shape: f32[4,12], index: 5, kind: output, shape index: {}]  }
   0x1   :  { %v21_v0 = vld [vmem:[%s564_s1] sm:$0xff]  ;;  %v22_v1 = vld [vmem:[%s564_s1 + $0x8] sm:$0xff]  ;;  %v23_v2 = vld [vmem:[%s564_s1 + $0x10] sm:$0xff]  ;;  %355 = vmatprep.subr.bf16.mxu0 %v406_v3  ;;  %317 = vmatprep.mubr.msk.f32.mxu0 %vm407_vm0, %v408_v6 }
   0x2   :  { %v356_v4 = vpack.c.bf16 %v22_v1, %v21_v0  ;;  %v24_v5 = vld [vmem:[%s564_s1 + $0x18] sm:$0xff]  ;;  %379 = vmatprep.subr.bf16.mxu1 %v406_v3  ;;  %352 = vmatprep.mubr.msk.f32.mxu1 %vm407_vm0, %v408_v6  ;;  %v25_v8 = vld [vmem:[%s564_s1 + $0x20] sm:$0xff]  ;;  %v26_v9 = vld [vmem:[%s564_s1 + $0x28] sm:$0xff] }
   0x3   :  { %v359_v7 = vpack.c.bf16 %v24_v5, %v23_v2  ;;  %v115_v10 = vld [vmem:[%s566_s3] sm:$0xff]  ;;  %v116_v11 = vld [vmem:[%s566_s3 + $0x8] sm:$0xff]  ;;  %v117_v12 = vld [vmem:[%s566_s3 + $0x10] sm:$0xff]  ;;  %v362_v14 = vpack.c.bf16 %v26_v9, %v25_v8 }
   0x4   :  { %357 = vmatpush3.bf16.msra.mxu0 %v356_v4  ;;  %v118_v13 = vld [vmem:[%s566_s3 + $0x18] sm:$0xff]  ;;  %v380_v15 = vpack.c.bf16 %v116_v11, %v115_v10  ;;  %v27_v16 = vld [vmem:[%s564_s1 + $0x30] sm:$0xff]  ;;  %v119_v19 = vld [vmem:[%s566_s3 + $0x20] sm:$0xff] }
   0x5   :  { %358 = vmatprep.subr.bf16.mxu0 %v406_v3  ;;  %v28_v17 = vld [vmem:[%s564_s1 + $0x38] sm:$0xff]  ;;  %v383_v18 = vpack.c.bf16 %v118_v13, %v117_v12  ;;  %v120_v20 = vld [vmem:[%s566_s3 + $0x28] sm:$0xff]  ;;  %v29_v22 = vld [vmem:[%s564_s1 + $0x40] sm:$0xff] }
   0x6   :  { %381 = vmatpush3.bf16.msra.mxu1 %v380_v15  ;;  %v365_v21 = vpack.c.bf16 %v28_v17, %v27_v16  ;;  %v30_v23 = vld [vmem:[%s564_s1 + $0x48] sm:$0xff]  ;;  %v386_v24 = vpack.c.bf16 %v120_v20, %v119_v19  ;;  %v121_v25 = vld [vmem:[%s566_s3 + $0x30] sm:$0xff]  ;;  %v122_v26 = vld [vmem:[%s566_s3 + $0x38] sm:$0xff] }
   0x7   :  { %382 = vmatprep.subr.bf16.mxu1 %v406_v3  ;;  %v368_v27 = vpack.c.bf16 %v30_v23, %v29_v22  ;;  %v31_v28 = vld [vmem:[%s564_s1 + $0x50] sm:$0xff]  ;;  %v32_v29 = vld [vmem:[%s564_s1 + $0x58] sm:$0xff]  ;;  %v389_v30 = vpack.c.bf16 %v122_v26, %v121_v25  ;;  %v123_v31 = vld [vmem:[%s566_s3 + $0x40] sm:$0xff] }
   0x8   :  { %360 = vmatpush3.bf16.msra.mxu0 %v359_v7  ;;  %v124_v32 = vld [vmem:[%s566_s3 + $0x48] sm:$0xff]  ;;  %v371_v33 = vpack.c.bf16 %v32_v29, %v31_v28  ;;  %v33_v34 = vld [vmem:[%s564_s1 + $0x60] sm:$0xff]  ;;  %v125_v37 = vld [vmem:[%s566_s3 + $0x50] sm:$0xff] }
   0x9   :  { %361 = vmatprep.subr.bf16.mxu0 %v406_v3  ;;  %v34_v35 = vld [vmem:[%s564_s1 + $0x68] sm:$0xff]  ;;  %v392_v36 = vpack.c.bf16 %v124_v32, %v123_v31  ;;  %v126_v38 = vld [vmem:[%s566_s3 + $0x58] sm:$0xff]  ;;  %v35_v40 = vld [vmem:[%s564_s1 + $0x70] sm:$0xff] }
   0xa   :  { %384 = vmatpush3.bf16.msra.mxu1 %v383_v18  ;;  %v374_v39 = vpack.c.bf16 %v34_v35, %v33_v34  ;;  %v36_v41 = vld [vmem:[%s564_s1 + $0x78] sm:$0xff]  ;;  %v395_v42 = vpack.c.bf16 %v126_v38, %v125_v37  ;;  %v127_v43 = vld [vmem:[%s566_s3 + $0x60] sm:$0xff]  ;;  %v128_v44 = vld [vmem:[%s566_s3 + $0x68] sm:$0xff] }
   0xb   :  { %385 = vmatprep.subr.bf16.mxu1 %v406_v3  ;;  %v377_v45 = vpack.c.bf16 %v36_v41, %v35_v40  ;;  %v398_v46 = vpack.c.bf16 %v128_v44, %v127_v43  ;;  %v20_v47 = vld [vmem:[%s563_s0] sm:$0xff]  ;;  %v129_v48 = vld [vmem:[%s566_s3 + $0x70] sm:$0xff]  ;;  %v130_v49 = vld [vmem:[%s566_s3 + $0x78] sm:$0xff] }
   0xc   :  { %363 = vmatpush3.bf16.msra.mxu0 %v362_v14  ;;  %v401_v50 = vpack.c.bf16 %v130_v49, %v129_v48  ;;  %v249_v51 = vld [vmem:[%s565_s2] ss:$0 sm:$0xff] }
   0xd   :  { %364 = vmatprep.subr.bf16.mxu0 %v406_v3  ;;  %v250_v56 = vld [vmem:[%s567_s4] ss:$0 sm:$0xff] }
   0xe   :  { %387 = vmatpush3.bf16.msra.mxu1 %v386_v24 }
   0xf   :  { %388 = vmatprep.subr.bf16.mxu1 %v406_v3 }
  0x10   :  { %366 = vmatpush3.bf16.msra.mxu0 %v365_v21 }
  0x11   :  { %367 = vmatprep.subr.bf16.mxu0 %v406_v3 }
  0x12   :  { %390 = vmatpush3.bf16.msra.mxu1 %v389_v30 }
  0x13   :  { %391 = vmatprep.subr.bf16.mxu1 %v406_v3 }
  0x14   :  { %369 = vmatpush3.bf16.msra.mxu0 %v368_v27 }
  0x15   :  { %370 = vmatprep.subr.bf16.mxu0 %v406_v3 }
  0x16   :  { %393 = vmatpush3.bf16.msra.mxu1 %v392_v36 }
  0x17   :  { %394 = vmatprep.subr.bf16.mxu1 %v406_v3 }
  0x18   :  { %372 = vmatpush3.bf16.msra.mxu0 %v371_v33 }
  0x19   :  { %373 = vmatprep.subr.bf16.mxu0 %v406_v3 }
  0x1a   :  { %396 = vmatpush3.bf16.msra.mxu1 %v395_v42 }
  0x1b   :  { %397 = vmatprep.subr.bf16.mxu1 %v406_v3 }
  0x1c   :  { %375 = vmatpush3.bf16.msra.mxu0 %v374_v39 }
  0x1d   :  { %376 = vmatprep.subr.bf16.mxu0 %v406_v3 }
  0x1e   :  { %399 = vmatpush3.bf16.msra.mxu1 %v398_v46 }
  0x1f   :  { %400 = vmatprep.subr.bf16.mxu1 %v406_v3 }
  0x20   :  { %378 = vmatpush3.bf16.msra.mxu0 %v377_v45 }
  0x22   :  { %402 = vmatpush3.bf16.msra.mxu1 %v401_v50 }
  0x23   :  { %318 = vmatmul.mubr.f32.vlgmr.msra.gmra.mrb[0].mxu0 %v20_v47 }
  0xf6   :  { %v110_v52 = vpop.f32.mrb[0].mxu0 }
  0xf7   :  { %v111_v53 = vadd.f32 %v249_v51, %v110_v52  ;;  %v319_v54 = vpop.f32.mrb[1].mxu0 }
  0xf9   :  { %v114_v55 = vmax.f32 %v111_v53, 0.0 }
  0xfb   :  { %353 = vmatmul.mubr.f32.vlgmr.msra.gmra.mrb[0].mxu1 %v114_v55 }
 0x1ce   :  { %v204_v57 = vpop.f32.mrb[0].mxu1 }
 0x1cf   :  { %v205_v58 = vadd.f32 %v250_v56, %v204_v57  ;;  %v354_v59 = vpop.f32.mrb[1].mxu1 }
 0x1d1   :  { %209 = vst.msk [vmem:[#allocation2] sm:$0xff] %vm208_vm1, %v205_v58 }
 0x1d8   :  { %v227_v60 = vld [vmem:[#allocation2] sm:$0xf] }
 0x1d9   :  { %228 = vst [vmem:[%s568_s5] sm:$0xf] %v227_v60 }

</bundles_post_ra>
